<compile_context>
chip_gen: v6e
topology: v6e:2x2x1
jax: 0.10.0
libtpu: 0.0.40
codegen_flags: <defaults>
</compile_context>

<pallas_src>
import functools

import jax
import jax.numpy as jnp
from jax.experimental import pallas as pl
from jax.experimental.pallas import tpu as pltpu

_LANES = 128  # lane width of a vreg


def _round_up(a, b):
    return ((a + b - 1) // b) * b


def _aten_kernel(x_ref, wt_ref, o_ref, *, exact):
    # x_ref : [tm, C]        tile of input rows (kept in HBM dtype, e.g. f32)
    # wt_ref: [C, O_tile]    transposed weight tile (pre-cast to MXU dtype)
    # o_ref : [tm, O_tile]
    x = x_ref[...]
    w = wt_ref[...]
    if x.dtype != w.dtype:
        x = x.astype(w.dtype)          # in-kernel cast: no extra HBM pass
    y = jnp.dot(x, w, preferred_element_type=jnp.float32)
    y = jnp.maximum(y, 0.0)            # ReLU (f32, VPU)
    e = jnp.exp(-y)                    # EUP; y >= 0 so exp(-y) in (0, 1]
    if exact:
        y = 1.0 / (1.0 + e)            # exact sigmoid (f32 reference path)
    else:
        y = pl.reciprocal(1.0 + e, approx=True)  # EUP rcp (fast path)
    o_ref[...] = y.astype(o_ref.dtype)


def aten_forward(x, weight, *, tm=None, tn=None, mxu_dtype=jnp.bfloat16,
                 out_dtype=None, force_tile_o=False):
    """x: [..., C]; weight: [O, C] (PyTorch nn.Linear layout, bias-free)."""
    *lead, C = x.shape
    O, C2 = weight.shape
    assert C == C2, "channel mismatch"
    out_dtype = out_dtype if out_dtype is not None else x.dtype

    x2 = x.reshape(-1, C)
    M = x2.shape[0]
    x_bytes = x2.dtype.itemsize
    out_bytes = jnp.dtype(out_dtype).itemsize

    # One-time weight transpose + cast (x is cast in-kernel instead).
    w_dtype = mxu_dtype if mxu_dtype is not None else weight.dtype
    wt = weight.T.astype(w_dtype)                     # [C, O]
    w_bytes = jnp.dtype(w_dtype).itemsize

    # ---- output-column layout ------------------------------------------
    # Tile the weight along O when it is too big to keep VMEM-resident
    # (important on v7x: 64 MiB physical) or when explicitly forced.
    weight_resident_max = 8 << 20
    tile_o = force_tile_o or (C * _round_up(O, _LANES) * w_bytes > weight_resident_max)
    # Lane-pad O only when the pad fraction is small (O >= 128) or we tile.
    O_eff = _round_up(O, _LANES) if (tile_o or O >= _LANES) else O
    if O_eff != O:
        # zero-pad -> padded outputs are sigmoid(0)=0.5 and sliced off below.
        wt = jnp.pad(wt, ((0, 0), (0, O_eff - O)))

    if tile_o:
        tn_eff = tn if tn is not None else 512
        tn_eff = min(O_eff, max(_LANES, _round_up(tn_eff, _LANES)))
        O_tile = tn_eff
        weight_vmem = 2 * C * tn_eff * w_bytes        # double-buffered tile
    else:
        tn_eff = O_eff
        O_tile = O_eff
        weight_vmem = C * O_eff * w_bytes             # single resident copy

    # ---- row tile --------------------------------------------------------
    row_align = 8 if x_bytes == 4 else (16 if x_bytes == 2 else 32)
    per_row = 2 * C * x_bytes + 2 * O_tile * out_bytes   # double-buffered x/out
    budget = 40 << 20                                     # headroom under v7x 64 MiB
    if tm is None:
        tm = 512
    tm = min(tm, _round_up(M, row_align))
    tm_budget = max(row_align, (budget - weight_vmem) // max(per_row, 1))
    tm = min(tm, tm_budget)
    tm = max(row_align, (tm // row_align) * row_align)
    # v7x megacore: prefer >= 2 grid steps along a parallel axis when M allows.
    if (not tile_o) and tm >= M and M >= 2 * row_align:
        tm = _round_up(pl.cdiv(M, 2), row_align)

    # ---- VMEM limit from the real footprint ------------------------------
    footprint = weight_vmem + tm * per_row
    vmem_limit = int(min(64 << 20, max(16 << 20, footprint + footprint // 4 + (2 << 20))))

    kernel = functools.partial(_aten_kernel, exact=(mxu_dtype is None))
    out_shape = jax.ShapeDtypeStruct((M, O_eff), out_dtype)

    if tile_o:
        grid = (pl.cdiv(M, tm), pl.cdiv(O_eff, tn_eff))
        in_specs = [
            pl.BlockSpec((tm, C), lambda i, j: (i, 0)),        # x rows (const in j)
            pl.BlockSpec((C, tn_eff), lambda i, j: (0, j)),    # weight column tile
        ]
        out_specs = pl.BlockSpec((tm, tn_eff), lambda i, j: (i, j))
        semantics = ("parallel", "parallel")
    else:
        grid = (pl.cdiv(M, tm),)
        in_specs = [
            pl.BlockSpec((tm, C), lambda i: (i, 0)),           # tiled rows of x
            # Weight never changes across the grid: one VMEM-resident copy.
            pl.BlockSpec(memory_space=pltpu.MemorySpace.VMEM),
        ]
        out_specs = pl.BlockSpec((tm, O_eff), lambda i: (i, 0))
        semantics = ("parallel",)

    out = pl.pallas_call(
        kernel,
        out_shape=out_shape,
        grid_spec=pltpu.PrefetchScalarGridSpec(
            num_scalar_prefetch=0,
            grid=grid,
            in_specs=in_specs,
            out_specs=out_specs,
        ),
        compiler_params=pltpu.CompilerParams(
            dimension_semantics=semantics,
            vmem_limit_bytes=vmem_limit,
        ),
    )(x2, wt)

    y = out if O_eff == O else out[:, :O]
    return y.reshape(*lead, O)


def aten_reference(x, weight):
    y = x @ weight.T
    y = jnp.maximum(y, 0.0)
    return jax.nn.sigmoid(y)


if __name__ == "__main__":
    key = jax.random.PRNGKey(0)
    kx, kw, kx2, kw2 = jax.random.split(key, 4)

    # ---- Test 1: module-sized shapes: batch=2, seq=8, channel=32 -> out=16.
    B, S, C, O = 2, 8, 32, 16
    x = jax.random.normal(kx, (B, S, C), dtype=jnp.float32)
    # PyTorch nn.Linear weight layout [out_channels, channel].
    weight = jax.random.normal(kw, (O, C), dtype=jnp.float32) * (1.0 / jnp.sqrt(C))
    y_ref = aten_reference(x, weight)

    # Fast path: bf16 MXU inputs (cast in-kernel), f32 accumulation, EUP rcp.
    y = jax.block_until_ready(aten_forward(x, weight))
    assert y.shape == (B, S, O)
    assert jnp.allclose(y, y_ref, atol=2e-2, rtol=2e-2), "bf16 path mismatch vs reference"

    # Full-f32 path: exact sigmoid division.
    y32 = jax.block_until_ready(aten_forward(x, weight, mxu_dtype=None))
    assert jnp.allclose(y32, y_ref, atol=5e-3, rtol=5e-3), "f32 path mismatch vs reference"

    # ---- Test 2: exercise the O-tiled (2-D grid) path + a partial row block.
    M2, C2, O2 = 100, 64, 256
    x_b = jax.random.normal(kx2, (M2, C2), dtype=jnp.float32)
    w_b = jax.random.normal(kw2, (O2, C2), dtype=jnp.float32) * (1.0 / jnp.sqrt(C2))
    y2_ref = aten_reference(x_b, w_b)
    y2 = jax.block_until_ready(
        aten_forward(x_b, w_b, tm=64, tn=128, force_tile_o=True))
    assert y2.shape == (M2, O2)
    assert jnp.allclose(y2, y2_ref, atol=2e-2, rtol=2e-2), "tiled-O path mismatch vs reference"

    print("KERNEL_OK")
</pallas_src>

<mosaic_0001>
module attributes {stable_mosaic.version = 11 : i64} {
  func.func @_aten_kernel(%arg0: i32, %arg1: memref<8x32xf32, #tpu.memory_space<vmem>>, %arg2: memref<32x16xbf16, #tpu.memory_space<vmem>>, %arg3: memref<8x16xf32, #tpu.memory_space<vmem>>) attributes {dimension_semantics = [#tpu.dimension_semantics<parallel>], iteration_bounds = array<i64: 2>, scalar_prefetch = 0 : i64, scratch_operands = 0 : i64, tpu.core_type = #tpu.core_type<tc>, window_params = [{transform_indices = @transform_0, window_bounds = array<i64: 8, 32>}, {pipeline_mode = #tpu.pipeline_mode<synchronous>, transform_indices = @transform_1, window_bounds = array<i64: 32, 16>}, {transform_indices = @transform_2, window_bounds = array<i64: 8, 16>}]} {
    %c0 = arith.constant 0 : index
    %c0_0 = arith.constant 0 : index
    %0 = vector.load %arg1[%c0, %c0_0] : memref<8x32xf32, #tpu.memory_space<vmem>>, vector<8x32xf32>
    %c0_1 = arith.constant 0 : index
    %c0_2 = arith.constant 0 : index
    %1 = vector.load %arg2[%c0_1, %c0_2] : memref<32x16xbf16, #tpu.memory_space<vmem>>, vector<32x16xbf16>
    %2 = arith.truncf %0 : vector<8x32xf32> to vector<8x32xbf16>
    %cst = arith.constant dense<0.000000e+00> : vector<8x16xf32>
    %3 = tpu.matmul %2, %1, %cst {dimension_numbers = #tpu.dot_dimension_numbers<[1], [0], [0], [1], [0, 0, 1, 1], [], []>} : vector<8x32xbf16>, vector<32x16xbf16>, vector<8x16xf32> -> vector<8x16xf32>
    %cst_3 = arith.constant 0.000000e+00 : f32
    %4 = vector.broadcast %cst_3 : f32 to vector<8x16xf32>
    %5 = arith.maximumf %3, %4 : vector<8x16xf32>
    %cst_4 = arith.constant 0.000000e+00 : f32
    %6 = vector.broadcast %cst_4 : f32 to vector<8x16xf32>
    %7 = arith.subf %6, %5 : vector<8x16xf32>
    %8 = math.exp %7 : vector<8x16xf32>
    %cst_5 = arith.constant 1.000000e+00 : f32
    %9 = vector.broadcast %cst_5 : f32 to vector<8x16xf32>
    %10 = arith.addf %9, %8 : vector<8x16xf32>
    %11 = tpu.reciprocal %10 {approx = true} : vector<8x16xf32> -> vector<8x16xf32>
    %c0_6 = arith.constant 0 : index
    %c0_7 = arith.constant 0 : index
    %12 = vector.load %arg3[%c0_6, %c0_7] : memref<8x16xf32, #tpu.memory_space<vmem>>, vector<8x16xf32>
    tpu.vector_store %arg3[%c0_6, %c0_7], %11 {strides = array<i32>} : memref<8x16xf32, #tpu.memory_space<vmem>>, vector<8x16xf32>,
    return
  }
  func.func @transform_0(%arg0: i32) -> (i32, i32) {
    %c0_i32 = arith.constant 0 : i32
    %c0_i32_0 = arith.constant 0 : i32
    return %arg0, %c0_i32 : i32, i32
  }
  func.func @transform_1(%arg0: i32) -> (i32, i32) {
    %c0_i32 = arith.constant 0 : i32
    %c0_i32_0 = arith.constant 0 : i32
    %c0_i32_1 = arith.constant 0 : i32
    return %c0_i32, %c0_i32_0 : i32, i32
  }
  func.func @transform_2(%arg0: i32) -> (i32, i32) {
    %c0_i32 = arith.constant 0 : i32
    %c0_i32_0 = arith.constant 0 : i32
    return %arg0, %c0_i32 : i32, i32
  }
}

</mosaic_0001>

<bundles_post_ra>
// kernel: tpu_custom_call.1
= control target key start
LH: loop header
LB: loop body
LE: loop exit
PB: predicated region body
PF: predicated region fallthrough
CT: control target
= control target key end

     0   :  { %7 = vsyncpa [#allocation3], 0  ;;  %s533_s0 = inlined_call_operand.vmem [shape: f32[16,32], index: 0, kind: input, shape index: {}]   ;;  %s534_s1 = inlined_call_operand.vmem [shape: bf16[32,16], index: 1, kind: input, shape index: {}]   ;;  %s535_s2 = inlined_call_operand.hbm [shape: f32[16,16], index: 2, kind: output, shape index: {}]  }
   0x1   :  { %9 = vsyncpa [#allocation3 + $0x1], 0  ;;  %s434_s9 = smov 0   ;;  %s436_s10 = smov 0  }
   0x2   :  { %s438_s11 = smov 0   ;;  %s440_s12 = smov 0  }
   0x3 LB: > { %s455_s13 = sadd.s32 4294967295, %s414_s12   ;;  %s283_s14 = sadd.s32 4294967294, %s414_s12   ;;  %s414_s12 = sphi %s440_s12, %s541_s12   ;;  %s410_s11 = sphi %s438_s11, %s540_s11   ;;  %s406_s10 = sphi %s436_s10, %s539_s10   ;;  %s402_s9 = sphi %s434_s9, %s538_s9  }
   0x4   : > { %s459_s15 = sadd.s32 1, %s414_s12   ;;  %s69_s16 = sadd.s32 1, %s410_s11 }
   0x5   : > { %s66_s17 = ssub.s32 %s414_s12, %s459_s15  ;;  %p79_p0 = scmp.ne.s32.totalorder %s410_s11, %s406_s10 }
   0x6   : > { %p67_p1 = scmp.eq.s32.totalorder %s66_s17, 0  ;;  %p80_p2 = scmp.eq.s32.totalorder %s455_s13, 1 }
   0x7   : > { %p85_p3 = scmp.ne.s32.totalorder %s406_s10, %s402_s9  ;;  %p86_p4 = scmp.eq.s32.totalorder %s283_s14, 1 }
   0x8   : > { %s470_s18 = scalar_select %p67_p1, %s410_s11, %s69_s16  }
   0x9   : > { %p472_p5 = por %p80_p2, %p79_p0  ;;  %p476_p6 = por %p86_p4, %p85_p3 }
   0xa   : > { %p286_p7 = scmp.ge.s32.totalorder %s414_s12, 1  ;;  %p114_p8 = scmp.lt.s32.totalorder %s414_s12, 3 }
   0xc   : > { %p115_p9 = pnand %p286_p7, %p114_p8 }
   0xd   : > { %p135_p10 = scmp.lt.s32.totalorder (!%p115_p9), %s455_s13, 1  ;;  %s132_s30 = sand.u32 (!%p115_p9), 1, %s406_s10  }
   0xe   : > { %118 = sbr.rel (%p115_p9) target bundleno = 270 (0x10e), region = 28  ;;  %s287_s3 = sshll.u32 (!%p115_p9), %s132_s30, 3 }
   0xf   : > { %s293_s4 = sshll.u32 (!%p115_p9), %s455_s13, 7  ;;  %s134_s5 = scalar_lea.vmem (!%p115_p9), [#allocation2], %s287_s3 }
  0x10   : > { %s224_s6 = sshll.u32 (!%p115_p9), %s134_s5, 4  ;;  %s498_s14 = scalar_lea.hbm (!%p115_p9), %s535_s2, %s293_s4  ;;  %s225_s6 = int_to_ptr.vmem [resolvable:$true] %s224_s6 }
  0x11   : > { %s211_s16 = scalar_lea.sflag (!%p115_p9), [#allocation3], %s132_s30  ;;  %s354_s17 = scalar_lea.vmem (!%p115_p9), %s225_s6, 128 }
  0x12   : > { %p355_p11 = scmp.ne.s32.totalorder (!%p115_p9), %s225_s6, %s354_s17  ;;  %s418_s21 = smov (!%p115_p9), [#allocation2]  }
  0x13   : > { %v348_v0 = vld [vmem:[%s534_s1 + $0x8] sm:$0xff]   ;;  %v416_v1 = vmov 0.0   ;;  %v349_v2 = vld [vmem:[%s534_s1] sm:$0xff]   ;;  %vm417_vm0 = vmmov 0   ;;  %s136_s25 = scalar_select %p135_p10, %s455_s13, 1  ;;  %vm158_vm1 = vcmask 261120  }
  0x14   : > { %299 = vmatprep.subr.bf16.mxu0 %v416_v1  ;;  %303 = vmatprep.mubr.msk.bf16.mxu0 %vm417_vm0, %v416_v1  ;;  %vm208_vm2 = vcmask 130048   ;;  %p356_p12 = pnand %p355_p11, %p472_p5  ;;  %s358_s22 = sshll.u32 %s418_s21, 4  ;;  %s359_s22 = int_to_ptr.vmem [resolvable:$false] %s358_s22 }
  0x15   : > { %300 = vmatpush3.bf16.msra.mxu0 %v348_v0  ;;  %s288_s26 = sshll.u32 %s136_s25, 3  ;;  %s360_s13 = scalar_lea.vmem %s359_s22, 256 }
  0x16   : > { %301 = vmatprep.subr.bf16.mxu0 %v416_v1  ;;  %s138_s29 = scalar_lea.vmem %s533_s0, %s288_s26  ;;  %p357_p13 = pneg %p356_p12 }
  0x17   : > { %v140_v3 = vld [vmem:[%s138_s29] sm:$0xff]  ;;  %p361_p0 = scmp.lt.s32.totalorder %s225_s6, %s359_s22  ;;  %p362_p1 = scmp.lt.s32.totalorder %s360_s13, %s354_s17 }
  0x18   : > { %v145_v4 = vpack.c.bf16 %v140_v3, %v140_v3 }
  0x19   : > { %302 = vmatpush3.bf16.msra.mxu0 %v349_v2  ;;  %p363_p2 = por %p362_p1, %p361_p0 }
  0x1b   : > { %p364_p3 = pnand %p363_p2, %p357_p13 }
  0x1c   : > { %304 = vmatmul.mubr.msk.bf16.vlgmr.msra.gmra.mxu0 %vm158_vm1, %v145_v4 }
  0xdc   : > { %v196_v5 = vpop.f32.mrf.mxu0 }
  0xdd   : > { %v202_v6 = vmax.f32 %v196_v5, 0.0 }
  0xde   : > { %v305_v7 = vpop.f32.mrf.mxu0 }
  0xdf   : > { %v203_v8 = vsub.f32 0.0, %v202_v6 }
  0xe0   : > { %v199_v9 = vpop.f32.mrf.mxu0 }
  0xe1   : > { %v204_v10 = vmul.f32 1.442695, %v203_v8 }
  0xe2   : > { %v306_v11 = vpop.f32.mrf.mxu0 }
  0xe3   : > { %350 = vpow2.f32 %v204_v10 }
  0xf0   : > { %v351_v12 = vpop.eup %350 }
  0xf1   : > { %v206_v13 = vadd.f32 1.0, %v351_v12 }
  0xf3   : > { %352 = vrcp.f32 %v206_v13 }
 0x100   : > { %v353_v14 = vpop.eup %352 }
 0x101   : > { %209 = vst.msk [vmem:[%s134_s5] sm:$0xff] %vm208_vm2, %v353_v14 }
 0x102   : > { %367 = shalt.err (!%p364_p3)
}
 0x103   : > { %s368_s23 = scalar_lea.hbm %s498_s14, 128  ;;  %s372_s26 = scalar_lea.hbm %s535_s2, 256 }
 0x104   : > { %p369_p4 = scmp.ne.s32.totalorder %s498_s14, %s368_s23  ;;  %p373_p9 = scmp.lt.s32.totalorder %s498_s14, %s535_s2 }
 0x105   : > { %p374_p10 = scmp.lt.s32.totalorder %s372_s26, %s368_s23 }
 0x106   : > { %p370_p7 = pnand %p369_p4, %p472_p5 }
 0x107   : > { %p375_p11 = por %p374_p10, %p373_p9 }
 0x108   : > { %p371_p8 = pneg %p370_p7 }
 0x10a   : > { %p376_p12 = pnand %p375_p11, %p371_p8 }
 0x10c   : > { %379 = shalt.err (!%p376_p12)
}
 0x10d   : > { %307 = dma.vmem_to_hbm [thread:$0]  (%p472_p5), %s225_s6, 128, %s498_s14, %s211_s16  }
 0x10e PF: > { %p313_p13 = scmp.ge.s32.totalorder %s414_s12, 2  ;;  %s236_s29 = sand.u32 1, %s402_s9  }
 0x10f   : > { %s237_s30 = scalar_lea.sflag [#allocation3], %s236_s29 }
 0x110   : > { %p310_p0 = pnand %p313_p13, %p476_p6 }
 0x112   : > { %p311_p1 = pneg %p310_p0 }
 0x114   : > { %397 = dma.done.wait (%p311_p1), %s237_s30, 128  }
 0x115   : > { %399 = vsyncadd (%p311_p1), %s237_s30, 4294967168  ;;  %p12_p2 = scmp.ge.s32.totalorder %s459_s15, 4   ;;  %s538_s9 = smov %s406_s10 }
 0x116   : > { %s539_s10 = smov %s410_s11  ;;  %s540_s11 = smov %s470_s18 }
 0x117   : > { %s541_s12 = smov %s459_s15  ;;  %14 = sbr.rel (!%p12_p2) target bundleno = 3 (0x3), region = 63 }
 0x11c   :  { %242 = vsyncpa [#allocation3], 1 }
 0x11d   :  { %244 = vsyncpa [#allocation3 + $0x1], 1 }

</bundles_post_ra>
